<compile_context>
chip_gen: v5e
topology: v5e:2x2
jax: 0.10.0
libtpu: 0.0.40
codegen_flags: <defaults>
</compile_context>

<pallas_src>
import jax
import jax.numpy as jnp
from jax.experimental import pallas as pl
from jax.experimental.pallas import tpu as pltpu  # noqa: F401  (kept for TPU builds)

# ---------------------------------------------------------------- config ----
B = 2                      # batch
NMAX = 16                  # max nodes  (len(n_node_dist.probs))
E_DIM = 7                  # embedding dim
Z_DIM = E_DIM + 1          # z_dim = embedding_dim + 1
LAYERS = [32, 32]          # layers_
N_DIM = 4                  # node feature dim
DEPTH = [Z_DIM] + LAYERS   # [8, 32, 32]
N_LAYERS = len(LAYERS)
D_LAST = DEPTH[-1]
TEMPERATURE = 0.1          # provably does not affect the binarized forward output
IN_EPS = 1e-5              # InstanceNorm1d default eps
LANES = 128
LOGIT_CLIP = 13.815511     # logit(1 - 1e-6)  (== clipping probs to [1e-6, 1-1e-6])


# ------------------------------------------------------- param slab layout --
def _build_layout():
    layout = {}
    row = 0

    def add(name, shape):
        nonlocal row
        layout[name] = (row, shape[0], shape[1])
        row += ((shape[0] + 7) // 8) * 8        # keep every block 8-row aligned

    for l in range(N_LAYERS):
        d_in, d_out = DEPTH[l], DEPTH[l + 1]
        add(f"gamma{l}", (1, d_in))
        add(f"beta{l}", (1, d_in))
        add(f"wcat{l}", (d_in, 2 * d_out))      # [w1 | wsc]
        add(f"bcat{l}", (1, 2 * d_out))         # [b1 | bsc]
        add(f"w2_{l}", (d_out, d_out))
        add(f"b2_{l}", (1, d_out))
    add("wnode", (D_LAST, N_DIM))               # folded wn1 @ wn2
    add("bnode", (1, N_DIM))                    # folded bn1 @ wn2 + bn2
    return layout, row


LAYOUT, SLAB_ROWS = _build_layout()             # 208 rows x 128 lanes (f32)


# ---------------------------------------------------------------- kernel ----
def mlp_generator_kernel(zin_ref, p_ref, out_ref):
    def par(name):
        r0, nr, nc = LAYOUT[name]
        return p_ref[r0:r0 + nr, 0:nc]

    Q = zin_ref[:, 0:Z_DIM]                                  # (B*NMAX, Z_DIM)

    # ------------- standard_fw: InstanceNorm + FeedForward + skip ----------
    for l in range(N_LAYERS):
        d_in, d_out = DEPTH[l], DEPTH[l + 1]
        # InstanceNorm1d on Q.permute(0,2,1): normalize over the node axis,
        # per batch & per channel, biased variance, affine (gamma, beta).
        # One-pass stats: single cross-sublane reduce of [qb | qb*qb].
        qn_blocks = []
        for b in range(B):
            qb = Q[b * NMAX:(b + 1) * NMAX, :]
            stats = jnp.mean(jnp.concatenate([qb, qb * qb], axis=1),
                             axis=0, keepdims=True)          # (1, 2*d_in)
            mean = stats[:, :d_in]
            var = jnp.maximum(stats[:, d_in:2 * d_in] - mean * mean, 0.0)
            qn_blocks.append((qb - mean) * jax.lax.rsqrt(var + IN_EPS))
        qn = jnp.concatenate(qn_blocks, axis=0) * par(f"gamma{l}") + par(f"beta{l}")

        # fused [FeedForward layer 1 | skip connection] matmul
        hc = jnp.dot(qn, par(f"wcat{l}"),
                     preferred_element_type=jnp.float32) + par(f"bcat{l}")
        h = jnp.maximum(hc[:, :d_out], 0.0)                  # ReLU branch
        sc = hc[:, d_out:2 * d_out]                          # skip branch
        Q = jnp.dot(h, par(f"w2_{l}"),
                    preferred_element_type=jnp.float32) + par(f"b2_{l}") + sc

    # ------------- node_readout (algebraically folded, no activation) ------
    X = jnp.dot(Q, par("wnode"), preferred_element_type=jnp.float32) + par("bnode")

    # ------------- edge readout + discretize --------------------------------
    # A = sigmoid(Q @ Q^T); RelaxedBernoulli rsample -> round -> zero diag ->
    # triu -> symmetrize.  With host-symmetrized logistic noise and symmetric
    # S this reduces to a sign test with the diagonal zeroed:
    #   relaxed = sigmoid((clip(s,±C) + logit(U)) / T);  round(relaxed) == 1
    #   iff clip(s,±C) + logit(U) > 0   (T > 0; '>' matches half-to-even tie).
    row = jax.lax.broadcasted_iota(jnp.int32, (NMAX, NMAX), 0)
    col = jax.lax.broadcasted_iota(jnp.int32, (NMAX, NMAX), 1)
    offdiag = row != col
    a_blocks = []
    for b in range(B):
        qb = Q[b * NMAX:(b + 1) * NMAX, :]
        sb = jax.lax.dot_general(qb, qb,
                                 dimension_numbers=(((1,), (1,)), ((), ())),
                                 preferred_element_type=jnp.float32)  # (NMAX, NMAX)
        logits = jnp.clip(sb, -LOGIT_CLIP, LOGIT_CLIP)
        noise = zin_ref[b * NMAX:(b + 1) * NMAX, Z_DIM:Z_DIM + NMAX]  # symmetric
        ar = ((logits + noise) > 0.0).astype(jnp.float32)
        a_blocks.append(jnp.where(offdiag, ar, 0.0))
    A = jnp.concatenate(a_blocks, axis=0)                             # (B*NMAX, NMAX)

    # ------------- single lane-dense packed store ---------------------------
    pad = jnp.zeros((B * NMAX, LANES - (D_LAST + N_DIM + NMAX)), jnp.float32)
    out_ref[...] = jnp.concatenate([Q, X, A, pad], axis=1)            # (B*NMAX, 128)


# --------------------------------------------------------------- wrapper ----
def init_params(key):
    """PyTorch-style init: Linear ~ U(-1/sqrt(fan_in), +), InstanceNorm affine=1/0."""
    def linear(k, fan_in, fan_out):
        k1, k2 = jax.random.split(k)
        bound = 1.0 / float(fan_in) ** 0.5
        w = jax.random.uniform(k1, (fan_in, fan_out), jnp.float32, -bound, bound)
        b = jax.random.uniform(k2, (1, fan_out), jnp.float32, -bound, bound)
        return w, b

    keys = iter(jax.random.split(key, 3 * N_LAYERS + 2))
    p = {}
    for l in range(N_LAYERS):
        d_in, d_out = DEPTH[l], DEPTH[l + 1]
        p[f"gamma{l}"] = jnp.ones((1, d_in), jnp.float32)
        p[f"beta{l}"] = jnp.zeros((1, d_in), jnp.float32)
        p[f"w1_{l}"], p[f"b1_{l}"] = linear(next(keys), d_in, d_out)   # FF layer 1
        p[f"w2_{l}"], p[f"b2_{l}"] = linear(next(keys), d_out, d_out)  # FF layer 2
        p[f"wsc_{l}"], p[f"bsc_{l}"] = linear(next(keys), d_in, d_out)  # skip
    p["wn1"], p["bn1"] = linear(next(keys), D_LAST, N_DIM)  # node_readout layer 1
    p["wn2"], p["bn2"] = linear(next(keys), N_DIM, N_DIM)   # node_readout layer 2
    return p


def pack_params(p):
    """Host-side algebraic folding + packing into one (SLAB_ROWS, 128) slab."""
    slab = jnp.zeros((SLAB_ROWS, LANES), jnp.float32)

    def put(s, name, arr):
        r0, nr, nc = LAYOUT[name]
        assert arr.shape == (nr, nc), (name, arr.shape, (nr, nc))
        return s.at[r0:r0 + nr, :nc].set(arr)

    for l in range(N_LAYERS):
        slab = put(slab, f"gamma{l}", p[f"gamma{l}"])
        slab = put(slab, f"beta{l}", p[f"beta{l}"])
        slab = put(slab, f"wcat{l}",
                   jnp.concatenate([p[f"w1_{l}"], p[f"wsc_{l}"]], axis=1))
        slab = put(slab, f"bcat{l}",
                   jnp.concatenate([p[f"b1_{l}"], p[f"bsc_{l}"]], axis=1))
        slab = put(slab, f"w2_{l}", p[f"w2_{l}"])
        slab = put(slab, f"b2_{l}", p[f"b2_{l}"])
    # node readout has no activation between its two Linear layers -> fold.
    slab = put(slab, "wnode", p["wn1"] @ p["wn2"])
    slab = put(slab, "bnode", p["bn1"] @ p["wn2"] + p["bn2"])
    return slab


def pack_inputs(z0, logistic):
    """Symmetrize the per-batch logistic noise (mirror strictly-upper to lower;
    the diagonal is zeroed in-kernel) and pack z + noise into ONE lane-dense
    (B*NMAX, 128) input slab: z in lanes [0, Z_DIM), noise in [Z_DIM, Z_DIM+NMAX)."""
    row = jnp.arange(NMAX)[:, None]
    col = jnp.arange(NMAX)[None, :]
    upper = jnp.where(col > row, logistic, 0.0)             # (B, NMAX, NMAX)
    noise_sym = upper + jnp.swapaxes(upper, 1, 2)
    zin = jnp.zeros((B * NMAX, LANES), jnp.float32)
    zin = zin.at[:, :Z_DIM].set(z0.reshape(B * NMAX, Z_DIM))
    zin = zin.at[:, Z_DIM:Z_DIM + NMAX].set(noise_sym.reshape(B * NMAX, NMAX))
    return zin


@jax.jit
def mlp_generator_forward(zin_packed, param_slab):
    # Gridless single-step call: total resident data (~105 KiB params +
    # ~20 KiB IO) is far below any generation's VMEM budget, so no tiling,
    # no vmem_limit_bytes, no dimension_semantics needed.
    packed = pl.pallas_call(
        mlp_generator_kernel,
        out_shape=jax.ShapeDtypeStruct((B * NMAX, LANES), jnp.float32),
    )(zin_packed, param_slab)
    q = packed[:, :D_LAST].reshape(B, NMAX, D_LAST)
    x = packed[:, D_LAST:D_LAST + N_DIM].reshape(B, NMAX, N_DIM)
    a = packed[:, D_LAST + N_DIM:D_LAST + N_DIM + NMAX].reshape(B, NMAX, NMAX)
    return x, a, q   # matches torch forward return order (X, A, Q)


# ------------------------------------------------------------------ main ----
if __name__ == "__main__":
    key = jax.random.PRNGKey(0)
    k_param, k_noise, k_u = jax.random.split(key, 3)

    param_slab = pack_params(init_params(k_param))

    # Build Z0 like get_Z0: randn noise (B, NMAX, E_DIM) + node-count column,
    # with rows >= N[b] zeroed out.
    N = jnp.array([10, 16], dtype=jnp.int32)                       # nodes / graph
    noise = jax.random.normal(k_noise, (B, NMAX, E_DIM), jnp.float32)
    node_idx = jnp.arange(NMAX)[None, :, None]                     # (1, NMAX, 1)
    valid = (node_idx < N[:, None, None]).astype(jnp.float32)      # (B, NMAX, 1)
    noise = noise * valid
    ns_col = N[:, None, None].astype(jnp.float32) * valid          # (B, NMAX, 1)
    z0 = jnp.concatenate([noise, ns_col], axis=-1)                 # (B, NMAX, Z_DIM)

    # RelaxedBernoulli logistic noise logit(U), generated on the host.
    u = jax.random.uniform(k_u, (B, NMAX, NMAX), jnp.float32,
                           minval=1e-6, maxval=1.0 - 1e-6)
    logistic_noise = jnp.log(u) - jnp.log1p(-u)

    zin_packed = pack_inputs(z0, logistic_noise)                   # (B*NMAX, 128)

    x, a, q = mlp_generator_forward(zin_packed, param_slab)
    jax.block_until_ready((x, a, q))

    # light sanity checks on the discretized adjacency
    assert x.shape == (B, NMAX, N_DIM) and q.shape == (B, NMAX, D_LAST)
    assert a.shape == (B, NMAX, NMAX)
    assert bool(jnp.all(jnp.isfinite(q))) and bool(jnp.all(jnp.isfinite(x)))
    assert bool(jnp.allclose(a, jnp.swapaxes(a, 1, 2)))                # symmetric
    assert bool(jnp.allclose(jnp.diagonal(a, axis1=1, axis2=2), 0.0))  # zero diag
    assert bool(jnp.all((a == 0.0) | (a == 1.0)))                      # binary

    print("KERNEL_OK")
</pallas_src>

<mosaic_0001>
module attributes {stable_mosaic.version = 11 : i64} {
  func.func @mlp_generator_kernel(%arg0: memref<32x128xf32, #tpu.memory_space<vmem>>, %arg1: memref<208x128xf32, #tpu.memory_space<vmem>>, %arg2: memref<32x128xf32, #tpu.memory_space<vmem>>) attributes {dimension_semantics = [], scalar_prefetch = 0 : i64, scratch_operands = 0 : i64, tpu.core_type = #tpu.core_type<tc>} {
    %c0 = arith.constant 0 : index
    %c0_0 = arith.constant 0 : index
    %0 = vector.load %arg0[%c0, %c0_0] : memref<32x128xf32, #tpu.memory_space<vmem>>, vector<32x8xf32>
    %1 = vector.extract_strided_slice %0 {offsets = [0, 0], sizes = [16, 8], strides = [1, 1]} : vector<32x8xf32> to vector<16x8xf32>
    %2 = arith.mulf %1, %1 : vector<16x8xf32>
    %3 = tpu.concatenate %1, %2 in 1 : vector<16x8xf32>, vector<16x8xf32> -> vector<16x16xf32>
    %cst = arith.constant dense<0.000000e+00> : vector<16xf32>
    %4 = vector.multi_reduction <add>, %3, %cst [0] : vector<16x16xf32> to vector<16xf32>
    %5 = vector.shape_cast %4 : vector<16xf32> to vector<1x16xf32>
    %cst_1 = arith.constant 1.600000e+01 : f32
    %6 = vector.broadcast %cst_1 : f32 to vector<1x16xf32>
    %7 = arith.divf %5, %6 : vector<1x16xf32>
    %8 = vector.extract_strided_slice %7 {offsets = [0, 0], sizes = [1, 8], strides = [1, 1]} : vector<1x16xf32> to vector<1x8xf32>
    %9 = vector.extract_strided_slice %7 {offsets = [0, 8], sizes = [1, 8], strides = [1, 1]} : vector<1x16xf32> to vector<1x8xf32>
    %10 = arith.mulf %8, %8 : vector<1x8xf32>
    %11 = arith.subf %9, %10 : vector<1x8xf32>
    %cst_2 = arith.constant 0.000000e+00 : f32
    %12 = vector.broadcast %cst_2 : f32 to vector<1x8xf32>
    %13 = arith.maximumf %11, %12 : vector<1x8xf32>
    %14 = vector.broadcast %8 : vector<1x8xf32> to vector<16x8xf32>
    %15 = arith.subf %1, %14 : vector<16x8xf32>
    %cst_3 = arith.constant 9.99999974E-6 : f32
    %16 = vector.broadcast %cst_3 : f32 to vector<1x8xf32>
    %17 = arith.addf %13, %16 : vector<1x8xf32>
    %18 = math.rsqrt %17 : vector<1x8xf32>
    %19 = vector.broadcast %18 : vector<1x8xf32> to vector<16x8xf32>
    %20 = arith.mulf %15, %19 : vector<16x8xf32>
    %21 = vector.extract_strided_slice %0 {offsets = [16, 0], sizes = [16, 8], strides = [1, 1]} : vector<32x8xf32> to vector<16x8xf32>
    %22 = arith.mulf %21, %21 : vector<16x8xf32>
    %23 = tpu.concatenate %21, %22 in 1 : vector<16x8xf32>, vector<16x8xf32> -> vector<16x16xf32>
    %cst_4 = arith.constant dense<0.000000e+00> : vector<16xf32>
    %24 = vector.multi_reduction <add>, %23, %cst_4 [0] : vector<16x16xf32> to vector<16xf32>
    %25 = vector.shape_cast %24 : vector<16xf32> to vector<1x16xf32>
    %cst_5 = arith.constant 1.600000e+01 : f32
    %26 = vector.broadcast %cst_5 : f32 to vector<1x16xf32>
    %27 = arith.divf %25, %26 : vector<1x16xf32>
    %28 = vector.extract_strided_slice %27 {offsets = [0, 0], sizes = [1, 8], strides = [1, 1]} : vector<1x16xf32> to vector<1x8xf32>
    %29 = vector.extract_strided_slice %27 {offsets = [0, 8], sizes = [1, 8], strides = [1, 1]} : vector<1x16xf32> to vector<1x8xf32>
    %30 = arith.mulf %28, %28 : vector<1x8xf32>
    %31 = arith.subf %29, %30 : vector<1x8xf32>
    %cst_6 = arith.constant 0.000000e+00 : f32
    %32 = vector.broadcast %cst_6 : f32 to vector<1x8xf32>
    %33 = arith.maximumf %31, %32 : vector<1x8xf32>
    %34 = vector.broadcast %28 : vector<1x8xf32> to vector<16x8xf32>
    %35 = arith.subf %21, %34 : vector<16x8xf32>
    %cst_7 = arith.constant 9.99999974E-6 : f32
    %36 = vector.broadcast %cst_7 : f32 to vector<1x8xf32>
    %37 = arith.addf %33, %36 : vector<1x8xf32>
    %38 = math.rsqrt %37 : vector<1x8xf32>
    %39 = vector.broadcast %38 : vector<1x8xf32> to vector<16x8xf32>
    %40 = arith.mulf %35, %39 : vector<16x8xf32>
    %41 = tpu.concatenate %20, %40 in 0 : vector<16x8xf32>, vector<16x8xf32> -> vector<32x8xf32>
    %c0_8 = arith.constant 0 : index
    %c0_9 = arith.constant 0 : index
    %42 = vector.load %arg1[%c0_8, %c0_9] : memref<208x128xf32, #tpu.memory_space<vmem>>, vector<1x8xf32>
    %43 = vector.broadcast %42 : vector<1x8xf32> to vector<32x8xf32>
    %44 = arith.mulf %41, %43 : vector<32x8xf32>
    %c8 = arith.constant 8 : index
    %c0_10 = arith.constant 0 : index
    %45 = vector.load %arg1[%c8, %c0_10] : memref<208x128xf32, #tpu.memory_space<vmem>>, vector<1x8xf32>
    %46 = vector.broadcast %45 : vector<1x8xf32> to vector<32x8xf32>
    %47 = arith.addf %44, %46 : vector<32x8xf32>
    %c16 = arith.constant 16 : index
    %c0_11 = arith.constant 0 : index
    %48 = vector.load %arg1[%c16, %c0_11] : memref<208x128xf32, #tpu.memory_space<vmem>>, vector<8x64xf32>
    %cst_12 = arith.constant dense<0.000000e+00> : vector<32x64xf32>
    %49 = tpu.matmul %47, %48, %cst_12 {dimension_numbers = #tpu.dot_dimension_numbers<[1], [0], [0], [1], [0, 0, 1, 1], [], []>} : vector<32x8xf32>, vector<8x64xf32>, vector<32x64xf32> -> vector<32x64xf32>
    %c24 = arith.constant 24 : index
    %c0_13 = arith.constant 0 : index
    %50 = vector.load %arg1[%c24, %c0_13] : memref<208x128xf32, #tpu.memory_space<vmem>>, vector<1x64xf32>
    %51 = vector.broadcast %50 : vector<1x64xf32> to vector<32x64xf32>
    %52 = arith.addf %49, %51 : vector<32x64xf32>
    %53 = vector.extract_strided_slice %52 {offsets = [0, 0], sizes = [32, 32], strides = [1, 1]} : vector<32x64xf32> to vector<32x32xf32>
    %cst_14 = arith.constant 0.000000e+00 : f32
    %54 = vector.broadcast %cst_14 : f32 to vector<32x32xf32>
    %55 = arith.maximumf %53, %54 : vector<32x32xf32>
    %56 = vector.extract_strided_slice %52 {offsets = [0, 32], sizes = [32, 32], strides = [1, 1]} : vector<32x64xf32> to vector<32x32xf32>
    %c32 = arith.constant 32 : index
    %c0_15 = arith.constant 0 : index
    %57 = vector.load %arg1[%c32, %c0_15] : memref<208x128xf32, #tpu.memory_space<vmem>>, vector<32x32xf32>
    %cst_16 = arith.constant dense<0.000000e+00> : vector<32x32xf32>
    %58 = tpu.matmul %55, %57, %cst_16 {dimension_numbers = #tpu.dot_dimension_numbers<[1], [0], [0], [1], [0, 0, 1, 1], [], []>} : vector<32x32xf32>, vector<32x32xf32>, vector<32x32xf32> -> vector<32x32xf32>
    %c64 = arith.constant 64 : index
    %c0_17 = arith.constant 0 : index
    %59 = vector.load %arg1[%c64, %c0_17] : memref<208x128xf32, #tpu.memory_space<vmem>>, vector<1x32xf32>
    %60 = vector.broadcast %59 : vector<1x32xf32> to vector<32x32xf32>
    %61 = arith.addf %58, %60 : vector<32x32xf32>
    %62 = arith.addf %61, %56 : vector<32x32xf32>
    %63 = vector.extract_strided_slice %62 {offsets = [0, 0], sizes = [16, 32], strides = [1, 1]} : vector<32x32xf32> to vector<16x32xf32>
    %64 = arith.mulf %63, %63 : vector<16x32xf32>
    %65 = tpu.concatenate %63, %64 in 1 : vector<16x32xf32>, vector<16x32xf32> -> vector<16x64xf32>
    %cst_18 = arith.constant dense<0.000000e+00> : vector<64xf32>
    %66 = vector.multi_reduction <add>, %65, %cst_18 [0] : vector<16x64xf32> to vector<64xf32>
    %67 = vector.shape_cast %66 : vector<64xf32> to vector<1x64xf32>
    %cst_19 = arith.constant 1.600000e+01 : f32
    %68 = vector.broadcast %cst_19 : f32 to vector<1x64xf32>
    %69 = arith.divf %67, %68 : vector<1x64xf32>
    %70 = vector.extract_strided_slice %69 {offsets = [0, 0], sizes = [1, 32], strides = [1, 1]} : vector<1x64xf32> to vector<1x32xf32>
    %71 = vector.extract_strided_slice %69 {offsets = [0, 32], sizes = [1, 32], strides = [1, 1]} : vector<1x64xf32> to vector<1x32xf32>
    %72 = arith.mulf %70, %70 : vector<1x32xf32>
    %73 = arith.subf %71, %72 : vector<1x32xf32>
    %cst_20 = arith.constant 0.000000e+00 : f32
    %74 = vector.broadcast %cst_20 : f32 to vector<1x32xf32>
    %75 = arith.maximumf %73, %74 : vector<1x32xf32>
    %76 = vector.broadcast %70 : vector<1x32xf32> to vector<16x32xf32>
    %77 = arith.subf %63, %76 : vector<16x32xf32>
    %cst_21 = arith.constant 9.99999974E-6 : f32
    %78 = vector.broadcast %cst_21 : f32 to vector<1x32xf32>
    %79 = arith.addf %75, %78 : vector<1x32xf32>
    %80 = math.rsqrt %79 : vector<1x32xf32>
    %81 = vector.broadcast %80 : vector<1x32xf32> to vector<16x32xf32>
    %82 = arith.mulf %77, %81 : vector<16x32xf32>
    %83 = vector.extract_strided_slice %62 {offsets = [16, 0], sizes = [16, 32], strides = [1, 1]} : vector<32x32xf32> to vector<16x32xf32>
    %84 = arith.mulf %83, %83 : vector<16x32xf32>
    %85 = tpu.concatenate %83, %84 in 1 : vector<16x32xf32>, vector<16x32xf32> -> vector<16x64xf32>
    %cst_22 = arith.constant dense<0.000000e+00> : vector<64xf32>
    %86 = vector.multi_reduction <add>, %85, %cst_22 [0] : vector<16x64xf32> to vector<64xf32>
    %87 = vector.shape_cast %86 : vector<64xf32> to vector<1x64xf32>
    %cst_23 = arith.constant 1.600000e+01 : f32
    %88 = vector.broadcast %cst_23 : f32 to vector<1x64xf32>
    %89 = arith.divf %87, %88 : vector<1x64xf32>
    %90 = vector.extract_strided_slice %89 {offsets = [0, 0], sizes = [1, 32], strides = [1, 1]} : vector<1x64xf32> to vector<1x32xf32>
    %91 = vector.extract_strided_slice %89 {offsets = [0, 32], sizes = [1, 32], strides = [1, 1]} : vector<1x64xf32> to vector<1x32xf32>
    %92 = arith.mulf %90, %90 : vector<1x32xf32>
    %93 = arith.subf %91, %92 : vector<1x32xf32>
    %cst_24 = arith.constant 0.000000e+00 : f32
    %94 = vector.broadcast %cst_24 : f32 to vector<1x32xf32>
    %95 = arith.maximumf %93, %94 : vector<1x32xf32>
    %96 = vector.broadcast %90 : vector<1x32xf32> to vector<16x32xf32>
    %97 = arith.subf %83, %96 : vector<16x32xf32>
    %cst_25 = arith.constant 9.99999974E-6 : f32
    %98 = vector.broadcast %cst_25 : f32 to vector<1x32xf32>
    %99 = arith.addf %95, %98 : vector<1x32xf32>
    %100 = math.rsqrt %99 : vector<1x32xf32>
    %101 = vector.broadcast %100 : vector<1x32xf32> to vector<16x32xf32>
    %102 = arith.mulf %97, %101 : vector<16x32xf32>
    %103 = tpu.concatenate %82, %102 in 0 : vector<16x32xf32>, vector<16x32xf32> -> vector<32x32xf32>
    %c72 = arith.constant 72 : index
    %c0_26 = arith.constant 0 : index
    %104 = vector.load %arg1[%c72, %c0_26] : memref<208x128xf32, #tpu.memory_space<vmem>>, vector<1x32xf32>
    %105 = vector.broadcast %104 : vector<1x32xf32> to vector<32x32xf32>
    %106 = arith.mulf %103, %105 : vector<32x32xf32>
    %c80 = arith.constant 80 : index
    %c0_27 = arith.constant 0 : index
    %107 = vector.load %arg1[%c80, %c0_27] : memref<208x128xf32, #tpu.memory_space<vmem>>, vector<1x32xf32>
    %108 = vector.broadcast %107 : vector<1x32xf32> to vector<32x32xf32>
    %109 = arith.addf %106, %108 : vector<32x32xf32>
    %c88 = arith.constant 88 : index
    %c0_28 = arith.constant 0 : index
    %110 = vector.load %arg1[%c88, %c0_28] : memref<208x128xf32, #tpu.memory_space<vmem>>, vector<32x64xf32>
    %cst_29 = arith.constant dense<0.000000e+00> : vector<32x64xf32>
    %111 = tpu.matmul %109, %110, %cst_29 {dimension_numbers = #tpu.dot_dimension_numbers<[1], [0], [0], [1], [0, 0, 1, 1], [], []>} : vector<32x32xf32>, vector<32x64xf32>, vector<32x64xf32> -> vector<32x64xf32>
    %c120 = arith.constant 120 : index
    %c0_30 = arith.constant 0 : index
    %112 = vector.load %arg1[%c120, %c0_30] : memref<208x128xf32, #tpu.memory_space<vmem>>, vector<1x64xf32>
    %113 = vector.broadcast %112 : vector<1x64xf32> to vector<32x64xf32>
    %114 = arith.addf %111, %113 : vector<32x64xf32>
    %115 = vector.extract_strided_slice %114 {offsets = [0, 0], sizes = [32, 32], strides = [1, 1]} : vector<32x64xf32> to vector<32x32xf32>
    %cst_31 = arith.constant 0.000000e+00 : f32
    %116 = vector.broadcast %cst_31 : f32 to vector<32x32xf32>
    %117 = arith.maximumf %115, %116 : vector<32x32xf32>
    %118 = vector.extract_strided_slice %114 {offsets = [0, 32], sizes = [32, 32], strides = [1, 1]} : vector<32x64xf32> to vector<32x32xf32>
    %c128 = arith.constant 128 : index
    %c0_32 = arith.constant 0 : index
    %119 = vector.load %arg1[%c128, %c0_32] : memref<208x128xf32, #tpu.memory_space<vmem>>, vector<32x32xf32>
    %cst_33 = arith.constant dense<0.000000e+00> : vector<32x32xf32>
    %120 = tpu.matmul %117, %119, %cst_33 {dimension_numbers = #tpu.dot_dimension_numbers<[1], [0], [0], [1], [0, 0, 1, 1], [], []>} : vector<32x32xf32>, vector<32x32xf32>, vector<32x32xf32> -> vector<32x32xf32>
    %c160 = arith.constant 160 : index
    %c0_34 = arith.constant 0 : index
    %121 = vector.load %arg1[%c160, %c0_34] : memref<208x128xf32, #tpu.memory_space<vmem>>, vector<1x32xf32>
    %122 = vector.broadcast %121 : vector<1x32xf32> to vector<32x32xf32>
    %123 = arith.addf %120, %122 : vector<32x32xf32>
    %124 = arith.addf %123, %118 : vector<32x32xf32>
    %c168 = arith.constant 168 : index
    %c0_35 = arith.constant 0 : index
    %125 = vector.load %arg1[%c168, %c0_35] : memref<208x128xf32, #tpu.memory_space<vmem>>, vector<32x4xf32>
    %cst_36 = arith.constant dense<0.000000e+00> : vector<32x4xf32>
    %126 = tpu.matmul %124, %125, %cst_36 {dimension_numbers = #tpu.dot_dimension_numbers<[1], [0], [0], [1], [0, 0, 1, 1], [], []>} : vector<32x32xf32>, vector<32x4xf32>, vector<32x4xf32> -> vector<32x4xf32>
    %c200 = arith.constant 200 : index
    %c0_37 = arith.constant 0 : index
    %127 = vector.load %arg1[%c200, %c0_37] : memref<208x128xf32, #tpu.memory_space<vmem>>, vector<1x4xf32>
    %128 = vector.broadcast %127 : vector<1x4xf32> to vector<32x4xf32>
    %129 = arith.addf %126, %128 : vector<32x4xf32>
    %130 = tpu.iota {dimensions = array<i32: 0>} : vector<16x16xi32>
    %131 = tpu.iota {dimensions = array<i32: 1>} : vector<16x16xi32>
    %132 = arith.cmpi ne, %130, %131 : vector<16x16xi32>
    %133 = vector.extract_strided_slice %124 {offsets = [0, 0], sizes = [16, 32], strides = [1, 1]} : vector<32x32xf32> to vector<16x32xf32>
    %cst_38 = arith.constant dense<0.000000e+00> : vector<16x16xf32>
    %134 = tpu.matmul %133, %133, %cst_38 {dimension_numbers = #tpu.dot_dimension_numbers<[1], [1], [0], [0], [0, 0, 1, 0], [], []>} : vector<16x32xf32>, vector<16x32xf32>, vector<16x16xf32> -> vector<16x16xf32>
    %cst_39 = arith.constant -13.8155107 : f32
    %cst_40 = arith.constant 13.8155107 : f32
    %135 = vector.broadcast %cst_39 : f32 to vector<16x16xf32>
    %136 = arith.maximumf %135, %134 : vector<16x16xf32>
    %137 = vector.broadcast %cst_40 : f32 to vector<16x16xf32>
    %138 = arith.minimumf %137, %136 : vector<16x16xf32>
    %c0_41 = arith.constant 0 : index
    %c8_42 = arith.constant 8 : index
    %139 = vector.load %arg0[%c0_41, %c8_42] : memref<32x128xf32, #tpu.memory_space<vmem>>, vector<16x16xf32>
    %140 = arith.addf %138, %139 : vector<16x16xf32>
    %cst_43 = arith.constant 0.000000e+00 : f32
    %141 = vector.broadcast %cst_43 : f32 to vector<16x16xf32>
    %142 = arith.cmpf ogt, %140, %141 : vector<16x16xf32>
    %143 = arith.extui %142 : vector<16x16xi1> to vector<16x16xi32>
    %144 = arith.sitofp %143 : vector<16x16xi32> to vector<16x16xf32>
    %cst_44 = arith.constant 0.000000e+00 : f32
    %145 = vector.broadcast %cst_44 : f32 to vector<16x16xf32>
    %146 = arith.select %132, %144, %145 : vector<16x16xi1>, vector<16x16xf32>
    %147 = vector.extract_strided_slice %124 {offsets = [16, 0], sizes = [16, 32], strides = [1, 1]} : vector<32x32xf32> to vector<16x32xf32>
    %cst_45 = arith.constant dense<0.000000e+00> : vector<16x16xf32>
    %148 = tpu.matmul %147, %147, %cst_45 {dimension_numbers = #tpu.dot_dimension_numbers<[1], [1], [0], [0], [0, 0, 1, 0], [], []>} : vector<16x32xf32>, vector<16x32xf32>, vector<16x16xf32> -> vector<16x16xf32>
    %cst_46 = arith.constant -13.8155107 : f32
    %cst_47 = arith.constant 13.8155107 : f32
    %149 = vector.broadcast %cst_46 : f32 to vector<16x16xf32>
    %150 = arith.maximumf %149, %148 : vector<16x16xf32>
    %151 = vector.broadcast %cst_47 : f32 to vector<16x16xf32>
    %152 = arith.minimumf %151, %150 : vector<16x16xf32>
    %c16_48 = arith.constant 16 : index
    %c8_49 = arith.constant 8 : index
    %153 = vector.load %arg0[%c16_48, %c8_49] : memref<32x128xf32, #tpu.memory_space<vmem>>, vector<16x16xf32>
    %154 = arith.addf %152, %153 : vector<16x16xf32>
    %cst_50 = arith.constant 0.000000e+00 : f32
    %155 = vector.broadcast %cst_50 : f32 to vector<16x16xf32>
    %156 = arith.cmpf ogt, %154, %155 : vector<16x16xf32>
    %157 = arith.extui %156 : vector<16x16xi1> to vector<16x16xi32>
    %158 = arith.sitofp %157 : vector<16x16xi32> to vector<16x16xf32>
    %cst_51 = arith.constant 0.000000e+00 : f32
    %159 = vector.broadcast %cst_51 : f32 to vector<16x16xf32>
    %160 = arith.select %132, %158, %159 : vector<16x16xi1>, vector<16x16xf32>
    %161 = tpu.concatenate %146, %160 in 0 : vector<16x16xf32>, vector<16x16xf32> -> vector<32x16xf32>
    %cst_52 = arith.constant 0.000000e+00 : f32
    %162 = vector.broadcast %cst_52 : f32 to vector<32x76xf32>
    %163 = tpu.concatenate %124, %129, %161, %162 in 1 : vector<32x32xf32>, vector<32x4xf32>, vector<32x16xf32>, vector<32x76xf32> -> vector<32x128xf32>
    %c0_53 = arith.constant 0 : index
    %c0_54 = arith.constant 0 : index
    %164 = vector.load %arg2[%c0_53, %c0_54] : memref<32x128xf32, #tpu.memory_space<vmem>>, vector<32x128xf32>
    tpu.vector_store %arg2[%c0_53, %c0_54], %163 {strides = array<i32>} : memref<32x128xf32, #tpu.memory_space<vmem>>, vector<32x128xf32>,
    return
  }
}

</mosaic_0001>

<bundles_post_ra>
// kernel: mlp_generator_forward.1
= control target key start
LH: loop header
LB: loop body
LE: loop exit
PB: predicated region body
PF: predicated region fallthrough
CT: control target
= control target key end

     0   :  { %7 = vsyncpa [#allocation3], 0  ;;  %s1070_s0 = inlined_call_operand.hbm [shape: f32[32,128], index: 0, kind: input, shape index: {}]   ;;  %s1071_s1 = inlined_call_operand.hbm [shape: f32[208,128], index: 1, kind: input, shape index: {}]   ;;  %s1072_s2 = inlined_call_operand.vmem [shape: f32[32,128], index: 2, kind: output, shape index: {}]  }
   0x1   :  { %s13_s11 = sshll.u32 %s1070_s0, 4  ;;  %s14_s11 = int_to_ptr.hbm [resolvable:$true] %s13_s11 }
   0x2   :  { %8 = vsyncpa [#allocation5], 0  ;;  %s841_s12 = smov [#allocation2]   ;;  %s26_s16 = sshll.u32 %s1071_s1, 4  ;;  %s27_s16 = int_to_ptr.hbm [resolvable:$true] %s26_s16 }
   0x3   :  { %s15_s13 = sshll.u32 %s841_s12, 4  ;;  %s842_s17 = smov 128   ;;  %s16_s13 = int_to_ptr.vmem [resolvable:$true] %s15_s13 }
   0x4   :  { %s843_s18 = smov 8   ;;  %s844_s19 = smov [#allocation4]  }
   0x5   :  { %21 = dma.hbm_to_vmem [thread:$0]  %s14_s11, 512, %s16_s13, [#allocation3], %s842_s17, %s842_s17, %s843_s18  }
   0x6   :  { %s28_s20 = sshll.u32 %s844_s19, 4  ;;  %s29_s20 = int_to_ptr.vmem [resolvable:$true] %s28_s20 }
   0x7   :  { %34 = dma.hbm_to_vmem [thread:$0]  %s27_s16, 3328, %s29_s20, [#allocation5], %s842_s17, %s842_s17, %s843_s18  }
   0x8   :  { %837 = dma.done.wait [#allocation3], 512  }
   0x9   :  { %838 = vsyncadd [#allocation3], 4294966784 }
   0xa   :  { %839 = dma.done.wait [#allocation5], 3328  }
   0xb   :  { %840 = vsyncadd [#allocation5], 4294963968  ;;  %v874_v0 = vld [vmem:[#allocation2] sm:$0xff]  ;;  %v876_v1 = vld [vmem:[#allocation2 + $0x10] sm:$0xff]  ;;  %v845_v8 = vmov 16.0   ;;  %vm57_vm0 = vcmask 64512  }
   0xc   :  { %v47_v2 = vmul.f32 %v874_v0, %v874_v0  ;;  %v105_v3 = vmul.f32 %v876_v1, %v876_v1  ;;  %v884_v4 = vld [vmem:[#allocation2 + $0x8] sm:$0xff]  ;;  %v886_v5 = vld [vmem:[#allocation2 + $0x18] sm:$0xff]  ;;  %779 = vrcp.f32 %v845_v8  ;;  %vm60_vm1 = vcmask 130048   ;;  %s846_s0 = smov 120   ;;  %s847_s1 = smov 96  }
   0xd   :  { %v48_v6 = vmul.f32 %v884_v4, %v884_v4  ;;  %v106_v7 = vmul.f32 %v886_v5, %v886_v5  ;;  %vm220_vm9 = vcmask 261120   ;;  %s848_s21 = smov 32   ;;  %vm294_vm10 = vcmask 523264   ;;  %s850_s22 = smov 36  }
   0xe   :  { %51 = vrot.lane.b32.xlu0 %v47_v2, %s843_s18  ;;  %109 = vrot.lane.b32.xlu1 %v105_v3, %s843_s18 }
  0x12   :  { %v780_v11 = vpop.eup %779 }
  0x13   :  { %v71_v13 = vmul.f32 16.0, %v780_v11  ;;  %vm75_vm2 = vweird.f32 %v780_v11 }
  0x15   :  { %v72_v23 = vsub.f32 1.0, %v71_v13  ;;  %v770_v13 = vld [vmem:[#allocation4] ss:$0 sm:$0xff] }
  0x16   :  { %53 = vrot.lane.b32.xlu0 %v48_v6, %s843_s18  ;;  %111 = vrot.lane.b32.xlu1 %v106_v7, %s843_s18 }
  0x17   :  { %v73_v28 = vmul.f32 %v780_v11, %v72_v23 }
  0x19   :  { %v74_v33 = vadd.f32 %v780_v11, %v73_v28 }
  0x1b   :  { %v902_v38 = vsel %vm75_vm2, %v780_v11, %v74_v33  ;;  %v214_v33 = vld [vmem:[#allocation4 + $0x20] sm:$0xff] }
  0x80   :  { %v52_v9 = vpop.permute.xlu0 %51  ;;  %v110_v10 = vpop.permute.xlu1 %109 }
  0x81   :  { %v115_v12 = vsel %vm57_vm0, %v876_v1, %v110_v10  ;;  %v58_v14 = vsel %vm57_vm0, %v874_v0, %v52_v9  ;;  %v166_v9 = vld [vmem:[#allocation4 + $0x10] sm:$0xff]  ;;  %v217_v10 = vld [vmem:[#allocation4 + $0x38] sm:$0xff] }
  0x82   :  { %v117_v15 = vsel %vm60_vm1, %v115_v12, 0.0  ;;  %v61_v20 = vsel %vm60_vm1, %v58_v14, 0.0  ;;  %196 = vmatpush.msra.mxu0 %v166_v9  ;;  %749 = vmatpush.msra.mxu3 %v166_v9 }
  0x83   :  { %245 = vmatpush.msra.mxu1 %v217_v10 }
  0x88   :  { %v54_v16 = vpop.permute.xlu0 %53  ;;  %v112_v17 = vpop.permute.xlu1 %111 }
  0x89   :  { %v59_v18 = vsel %vm57_vm0, %v884_v4, %v54_v16  ;;  %v116_v19 = vsel %vm57_vm0, %v886_v5, %v112_v17  ;;  %v771_v17 = vld [vmem:[#allocation4 + $0x8] ss:$0 sm:$0xff] }
  0x8a   :  { %v62_v21 = vsel %vm60_vm1, %v59_v18, 0.0  ;;  %v118_v22 = vsel %vm60_vm1, %v116_v19, 0.0 }
  0x8b   :  { %v63_v24 = vadd.f32 %v62_v21, %v61_v20  ;;  %v119_v25 = vadd.f32 %v118_v22, %v117_v15 }
  0x8d   :  { %v64_v26 = vrot.slane %v63_v24, 4  ;;  %v120_v27 = vrot.slane %v119_v25, 4 }
  0x8f   :  { %v65_v29 = vadd.f32 %v64_v26, %v63_v24  ;;  %v121_v30 = vadd.f32 %v120_v27, %v119_v25 }
  0x91   :  { %v66_v31 = vrot.slane %v65_v29, 2  ;;  %v122_v32 = vrot.slane %v121_v30, 2 }
  0x93   :  { %v67_v34 = vadd.f32 %v66_v31, %v65_v29  ;;  %v123_v35 = vadd.f32 %v122_v32, %v121_v30  ;;  %v216_v31 = vld [vmem:[#allocation4 + $0x30] sm:$0xff]  ;;  %v215_v32 = vld [vmem:[#allocation4 + $0x28] sm:$0xff] }
  0x94   :  { %246 = vmatpush.msra.mxu1 %v216_v31 }
  0x95   :  { %v68_v36 = vrot.slane %v67_v34, 1  ;;  %v124_v37 = vrot.slane %v123_v35, 1 }
  0x96   :  { %247 = vmatpush.msra.mxu1 %v215_v32 }
  0x97   :  { %v69_v39 = vadd.f32 %v68_v36, %v67_v34  ;;  %v125_v40 = vadd.f32 %v124_v37, %v123_v35  ;;  %v772_v34 = vld [vmem:[#allocation4 + $0x18] ss:$0 sm:$0xff] }
  0x98   :  { %248 = vmatpush.msra.mxu1 %v214_v33 }
  0x99   :  { %v77_v41 = vmul.f32 %v902_v38, %v69_v39  ;;  %v126_v43 = vmul.f32 %v125_v40, %v902_v38 }
  0x9b   :  { %v78_v42 = vmul.f32 %v77_v41, %v77_v41  ;;  %v127_v44 = vmul.f32 %v126_v43, %v126_v43  ;;  %v85_v11 = vsub.f32 %v874_v0, %v77_v41  ;;  %v86_v12 = vsub.f32 %v884_v4, %v77_v41 }
  0x9c   :  { %v134_v22 = vsub.f32 %v876_v1, %v126_v43  ;;  %v135_v25 = vsub.f32 %v886_v5, %v126_v43 }
  0x9d   :  { %80 = vrot.lane.b32.xlu2 %v78_v42, %s843_s18 }
  0xa5   :  { %129 = vrot.lane.b32.xlu2 %v127_v44, %s843_s18 }
  0xf7   :  { %v81_v45 = vpop.permute.xlu2 %80 }
  0xf8   :  { %v83_v46 = vsub.f32 %v77_v41, %v81_v45 }
  0xfa   :  { %v84_v47 = vmax.f32 %v83_v46, 0.0 }
  0xfc   :  { %v87_v48 = vadd.f32 1e-05, %v84_v47 }
  0xfe   :  { %781 = vrsqrt.f32 %v87_v48  ;;  %vm94_vm4 = vweird.f32 %v87_v48 }
  0xff   :  { %v130_v49 = vpop.permute.xlu2 %129 }
 0x100   :  { %v132_v50 = vsub.f32 %v126_v43, %v130_v49 }
 0x102   :  { %v133_v51 = vmax.f32 %v132_v50, 0.0 }
 0x104   :  { %v782_v52 = vpop.eup %781  ;;  %v136_v53 = vadd.f32 1e-05, %v133_v51 }
 0x105   :  { %v89_v54 = vmul.f32 %v782_v52, %v87_v48  ;;  %vm95_vm3 = vweird.f32 %v782_v52  ;;  %v773_v48 = vld [vmem:[#allocation4 + $0x40] ss:$0 sm:$0xff] }
 0x106   :  { %783 = vrsqrt.f32 %v136_v53  ;;  %vm96_vm5 = vmor %vm94_vm4, %vm95_vm3  ;;  %vm143_vm7 = vweird.f32 %v136_v53 }
 0x107   :  { %v90_v55 = vmul.f32 %v782_v52, %v89_v54 }
 0x109   :  { %v91_v56 = vmul.f32 0.5, %v90_v55 }
 0x10b   :  { %v92_v57 = vsub.f32 1.5, %v91_v56 }
 0x10c   :  { %v784_v58 = vpop.eup %783 }
 0x10d   :  { %v138_v59 = vmul.f32 %v784_v58, %v136_v53  ;;  %v93_v60 = vmul.f32 %v782_v52, %v92_v57  ;;  %vm144_vm6 = vweird.f32 %v784_v58 }
 0x10e   :  { %vm145_vm8 = vmor %vm143_vm7, %vm144_vm6  ;;  %vm693_vm7 = vcmask 293888  }
 0x10f   :  { %v139_v61 = vmul.f32 %v784_v58, %v138_v59  ;;  %v97_v62 = vsel %vm96_vm5, %v782_v52, %v93_v60 }
 0x110   :  { %v98_v63 = vperm.slane %v97_v62, 0 }
 0x111   :  { %v140_v2 = vmul.f32 0.5, %v139_v61 }
 0x112   :  { %100 = vrot.lane.b32.xlu0 %v98_v63, %s846_s0 }
 0x113   :  { %v141_v3 = vsub.f32 1.5, %v140_v2 }
 0x115   :  { %v142_v6 = vmul.f32 %v784_v58, %v141_v3 }
 0x117   :  { %v146_v7 = vsel %vm145_vm8, %v784_v58, %v142_v6  ;;  %vm698_vm8 = vcmask 424960  }
 0x118   :  { %v147_v8 = vperm.slane %v146_v7, 0 }
 0x11a   :  { %149 = vrot.lane.b32.xlu1 %v147_v8, %s846_s0 }
 0x184   :  { %v101_v14 = vpop.permute.xlu0 %100 }
 0x185   :  { %v103_v15 = vmul.f32 %v101_v14, %v85_v11  ;;  %v104_v16 = vmul.f32 %v101_v14, %v86_v12 }
 0x187   :  { %v156_v18 = vmul.f32 %v770_v13, %v103_v15  ;;  %v157_v19 = vmul.f32 %v770_v13, %v104_v16 }
 0x189   :  { %v162_v20 = vadd.f32 %v771_v17, %v156_v18  ;;  %v163_v21 = vadd.f32 %v771_v17, %v157_v19 }
 0x18b   :  { %713 = vmatmul.msk.f32.vlgmr.msra.gmra.mxu0 %vm57_vm0, %v162_v20  ;;  %714 = vmatmul.msk.f32.vlgmr.msra.gmra.mxu3 %vm57_vm0, %v163_v21 }
 0x18c   :  { %v150_v23 = vpop.permute.xlu1 %149 }
 0x18d   :  { %v152_v24 = vmul.f32 %v150_v23, %v134_v22  ;;  %v153_v27 = vmul.f32 %v150_v23, %v135_v25 }
 0x18f   :  { %v158_v26 = vmul.f32 %v770_v13, %v152_v24  ;;  %v159_v29 = vmul.f32 %v770_v13, %v153_v27 }
 0x191   :  { %v164_v28 = vadd.f32 %v771_v17, %v158_v26  ;;  %v165_v30 = vadd.f32 %v771_v17, %v159_v29 }
 0x193   :  { %715 = vmatmul.msk.f32.gmra.mxu3 %vm57_vm0, %v164_v28 }
 0x19b   :  { %716 = vmatmul.msk.f32.gmra.mxu3 %vm57_vm0, %v165_v30 }
 0x208   :  { %v198_v35 = vpop.f32.mrf.mxu0 }
 0x209   :  { %v199_v36 = vadd.f32 %v772_v34, %v198_v35 }
 0x20b   :  { %v210_v37 = vmax.f32 %v199_v36, 0.0  ;;  %266 = vrot.lane.b32.xlu2 %v199_v36, %s847_s1 }
 0x20d   :  { %717 = vmatmul.msk.f32.vlgmr.msra.gmra.mxu1 %vm220_vm9, %v210_v37 }
 0x20e   :  { %v201_v39 = vpop.f32.mrf.mxu3 }
 0x20f   :  { %v202_v40 = vadd.f32 %v772_v34, %v201_v39 }
 0x211   :  { %268 = vrot.lane.b32.xlu0 %v202_v40, %s847_s1  ;;  %v211_v41 = vmax.f32 %v202_v40, 0.0 }
 0x215   :  { %718 = vmatmul.msk.f32.gmra.mxu1 %vm220_vm9, %v211_v41 }
 0x216   :  { %v204_v42 = vpop.f32.mrf.mxu3 }
 0x217   :  { %v205_v43 = vadd.f32 %v772_v34, %v204_v42 }
 0x219   :  { %270 = vrot.lane.b32.xlu1 %v205_v43, %s847_s1  ;;  %v212_v44 = vmax.f32 %v205_v43, 0.0 }
 0x21d   :  { %719 = vmatmul.msk.f32.gmra.mxu1 %vm220_vm9, %v212_v44 }
 0x21e   :  { %v207_v45 = vpop.f32.mrf.mxu3 }
 0x21f   :  { %v208_v46 = vadd.f32 %v772_v34, %v207_v45 }
 0x221   :  { %272 = vrot.lane.b32.xlu2 %v208_v46, %s847_s1  ;;  %v213_v47 = vmax.f32 %v208_v46, 0.0 }
 0x225   :  { %720 = vmatmul.msk.f32.gmra.mxu1 %vm220_vm9, %v213_v47 }
 0x265   :  { %v267_v51 = vpop.permute.xlu2 %266 }
 0x27b   :  { %v273_v6 = vpop.permute.xlu2 %272 }
 0x283   :  { %v269_v56 = vpop.permute.xlu0 %268 }
 0x28a   :  { %v250_v49 = vpop.f32.mrf.mxu1 }
 0x28b   :  { %v251_v50 = vadd.f32 %v773_v48, %v250_v49  ;;  %v271_v61 = vpop.permute.xlu1 %270 }
 0x28d   :  { %v926_v52 = vadd.f32 %v267_v51, %v251_v50 }
 0x28f   :  { %v282_v53 = vmul.f32 %v926_v52, %v926_v52 }
 0x291   :  { %286 = vrot.lane.b32.xlu0 %v282_v53, %s848_s21 }
 0x292   :  { %v253_v54 = vpop.f32.mrf.mxu1 }
 0x293   :  { %v254_v55 = vadd.f32 %v773_v48, %v253_v54 }
 0x295   :  { %v931_v57 = vadd.f32 %v269_v56, %v254_v55 }
 0x297   :  { %v283_v58 = vmul.f32 %v931_v57, %v931_v57 }
 0x299   :  { %288 = vrot.lane.b32.xlu1 %v283_v58, %s848_s21 }
 0x29a   :  { %v256_v59 = vpop.f32.mrf.mxu1 }
 0x29b   :  { %v257_v60 = vadd.f32 %v773_v48, %v256_v59 }
 0x29d   :  { %v936_v62 = vadd.f32 %v271_v61, %v257_v60 }
 0x29f   :  { %v332_v63 = vmul.f32 %v936_v62, %v936_v62 }
 0x2a1   :  { %336 = vrot.lane.b32.xlu2 %v332_v63, %s848_s21 }
 0x2a2   :  { %v259_v2 = vpop.f32.mrf.mxu1 }
 0x2a3   :  { %v260_v3 = vadd.f32 %v773_v48, %v259_v2 }
 0x2a5   :  { %v941_v7 = vadd.f32 %v273_v6, %v260_v3  ;;  %v396_v6 = vld [vmem:[#allocation4 + $0x70] sm:$0xff] }
 0x2a6   :  { %423 = vmatpush.msra.mxu2 %v396_v6 }
 0x2a7   :  { %v333_v8 = vmul.f32 %v941_v7, %v941_v7 }
 0x2a9   :  { %338 = vrot.lane.b32.xlu0 %v333_v8, %s848_s21  ;;  %v395_v8 = vld [vmem:[#allocation4 + $0x68] sm:$0xff] }
 0x2aa   :  { %424 = vmatpush.msra.mxu2 %v395_v8 }
 0x2fb   :  { %v337_v20 = vpop.permute.xlu2 %336 }
 0x2fc   :  { %v342_v22 = vsel %vm220_vm9, %v936_v62, %v337_v20 }
 0x2fd   :  { %v344_v27 = vsel %vm294_vm10, %v342_v22, 0.0 }
 0x303   :  { %v287_v9 = vpop.permute.xlu0 %286 }
 0x304   :  { %v292_v10 = vsel %vm220_vm9, %v926_v52, %v287_v9  ;;  %v394_v9 = vld [vmem:[#allocation4 + $0x60] sm:$0xff] }
 0x305   :  { %v295_v13 = vsel %vm294_vm10, %v292_v10, 0.0  ;;  %v393_v10 = vld [vmem:[#allocation4 + $0x58] sm:$0xff]  ;;  %425 = vmatpush.msra.mxu2 %v394_v9 }
 0x307   :  { %426 = vmatpush.msra.mxu2 %v393_v10 }
 0x30b   :  { %v289_v11 = vpop.permute.xlu1 %288 }
 0x30c   :  { %v293_v12 = vsel %vm220_vm9, %v931_v57, %v289_v11 }
 0x30d   :  { %v296_v14 = vsel %vm294_vm10, %v293_v12, 0.0  ;;  %v447_v12 = vld [vmem:[#allocation4 + $0x98] sm:$0xff] }
 0x30e   :  { %v297_v15 = vadd.f32 %v296_v14, %v295_v13  ;;  %474 = vmatpush.msrb.mxu3 %v447_v12  ;;  %v774_v14 = vld [vmem:[#allocation4 + $0x48] ss:$0 sm:$0xff] }
 0x310   :  { %v298_v16 = vrot.slane %v297_v15, 4 }
 0x312   :  { %v299_v17 = vadd.f32 %v298_v16, %v297_v15 }
 0x314   :  { %v300_v18 = vrot.slane %v299_v17, 2 }
 0x316   :  { %v301_v19 = vadd.f32 %v300_v18, %v299_v17  ;;  %v775_v18 = vld [vmem:[#allocation4 + $0x50] ss:$0 sm:$0xff] }
 0x318   :  { %v302_v21 = vrot.slane %v301_v19, 1 }
 0x31a   :  { %v303_v23 = vadd.f32 %v302_v21, %v301_v19 }
 0x31b   :  { %v339_v24 = vpop.permute.xlu0 %338 }
 0x31c   :  { %v955_v25 = vmul.f32 %v303_v23, %v902_v38  ;;  %v343_v26 = vsel %vm220_vm9, %v941_v7, %v339_v24 }
 0x31d   :  { %v345_v28 = vsel %vm294_vm10, %v343_v26, 0.0 }
 0x31e   :  { %v346_v29 = vadd.f32 %v345_v28, %v344_v27  ;;  %v305_v30 = vmul.f32 %v955_v25, %v955_v25  ;;  %v312_v11 = vsub.f32 %v926_v52, %v955_v25  ;;  %v313_v16 = vsub.f32 %v931_v57, %v955_v25 }
 0x320   :  { %v347_v31 = vrot.slane %v346_v29, 4  ;;  %307 = vrot.lane.b32.xlu1 %v305_v30, %s848_s21  ;;  %v446_v30 = vld [vmem:[#allocation4 + $0x90] sm:$0xff] }
 0x321   :  { %475 = vmatpush.msrb.mxu3 %v446_v30 }
 0x322   :  { %v348_v32 = vadd.f32 %v347_v31, %v346_v29  ;;  %v445_v31 = vld [vmem:[#allocation4 + $0x88] sm:$0xff] }
 0x323   :  { %476 = vmatpush.msrb.mxu3 %v445_v31 }
 0x324   :  { %v349_v33 = vrot.slane %v348_v32, 2 }
 0x326   :  { %v350_v34 = vadd.f32 %v349_v33, %v348_v32  ;;  %v776_v32 = vld [vmem:[#allocation4 + $0x78] ss:$0 sm:$0xff] }
 0x328   :  { %v351_v35 = vrot.slane %v350_v34, 1 }
 0x32a   :  { %v352_v36 = vadd.f32 %v351_v35, %v350_v34 }
 0x32c   :  { %v965_v37 = vmul.f32 %v352_v36, %v902_v38 }
 0x32e   :  { %v354_v39 = vmul.f32 %v965_v37, %v965_v37  ;;  %v361_v23 = vsub.f32 %v936_v62, %v965_v37  ;;  %v362_v27 = vsub.f32 %v941_v7, %v965_v37  ;;  %v444_v62 = vld [vmem:[#allocation4 + $0x80] sm:$0xff] }
 0x32f   :  { %477 = vmatpush.msrb.mxu3 %v444_v62 }
 0x330   :  { %356 = vrot.lane.b32.xlu2 %v354_v39, %s848_s21 }
 0x38a   :  { %v357_v40 = vpop.permute.xlu2 %356 }
 0x38b   :  { %v359_v41 = vsub.f32 %v965_v37, %v357_v40 }
 0x38d   :  { %v360_v42 = vmax.f32 %v359_v41, 0.0 }
 0x38f   :  { %v363_v43 = vadd.f32 1e-05, %v360_v42 }
 0x391   :  { %785 = vrsqrt.f32 %v363_v43  ;;  %vm370_vm12 = vweird.f32 %v363_v43 }
 0x392   :  { %v308_v44 = vpop.permute.xlu1 %307 }
 0x393   :  { %v310_v45 = vsub.f32 %v955_v25, %v308_v44 }
 0x395   :  { %v311_v46 = vmax.f32 %v310_v45, 0.0  ;;  %v512_v45 = vld [vmem:[#allocation4 + $0xb0] sm:$0xff] }
 0x397   :  { %v786_v47 = vpop.eup %785  ;;  %v314_v48 = vadd.f32 1e-05, %v311_v46  ;;  %v511_v46 = vld [vmem:[#allocation4 + $0xa8] sm:$0xff] }
 0x398   :  { %v365_v49 = vmul.f32 %v786_v47, %v363_v43  ;;  %vm371_vm11 = vweird.f32 %v786_v47 }
 0x399   :  { %787 = vrsqrt.f32 %v314_v48  ;;  %vm372_vm13 = vmor %vm370_vm12, %vm371_vm11  ;;  %vm321_vm15 = vweird.f32 %v314_v48 }
 0x39a   :  { %v366_v38 = vmul.f32 %v786_v47, %v365_v49 }
 0x39c   :  { %v367_v50 = vmul.f32 0.5, %v366_v38 }
 0x39e   :  { %v368_v51 = vsub.f32 1.5, %v367_v50 }
 0x39f   :  { %v788_v53 = vpop.eup %787 }
 0x3a0   :  { %v316_v54 = vmul.f32 %v788_v53, %v314_v48  ;;  %v369_v55 = vmul.f32 %v786_v47, %v368_v51  ;;  %vm322_vm14 = vweird.f32 %v788_v53 }
 0x3a1   :  { %vm323_vm0 = vmor %vm321_vm15, %vm322_vm14 }
 0x3a2   :  { %v317_v56 = vmul.f32 %v788_v53, %v316_v54  ;;  %v373_v58 = vsel %vm372_vm13, %v786_v47, %v369_v55  ;;  %v777_v47 = vld [vmem:[#allocation4 + $0xa0] ss:$0 sm:$0xff] }
 0x3a3   :  { %v374_v59 = vperm.slane %v373_v58, 0 }
 0x3a4   :  { %v318_v60 = vmul.f32 0.5, %v317_v56 }
 0x3a5   :  { %376 = vrot.lane.b32.xlu1 %v374_v59, %s847_s1 }
 0x3a6   :  { %v319_v61 = vsub.f32 1.5, %v318_v60 }
 0x3a8   :  { %v320_v63 = vmul.f32 %v788_v53, %v319_v61 }
 0x3aa   :  { %v324_v2 = vsel %vm323_vm0, %v788_v53, %v320_v63 }
 0x3ab   :  { %v325_v3 = vperm.slane %v324_v2, 0  ;;  %v778_v2 = vld [vmem:[#allocation4 + $0xc8] ss:$0 sm:$0xff] }
 0x3ad   :  { %327 = vrot.lane.b32.xlu0 %v325_v3, %s847_s1 }
 0x417   :  { %v377_v22 = vpop.permute.xlu1 %376 }
 0x418   :  { %v379_v52 = vmul.f32 %v377_v22, %v361_v23  ;;  %v380_v57 = vmul.f32 %v377_v22, %v362_v27 }
 0x41a   :  { %v385_v26 = vmul.f32 %v774_v14, %v379_v52  ;;  %v386_v28 = vmul.f32 %v774_v14, %v380_v57 }
 0x41c   :  { %v391_v25 = vadd.f32 %v775_v18, %v385_v26  ;;  %v392_v29 = vadd.f32 %v775_v18, %v386_v28  ;;  %v849_v26 = vmov 0.0  }
 0x41f   :  { %v328_v13 = vpop.permute.xlu0 %327 }
 0x420   :  { %v330_v15 = vmul.f32 %v328_v13, %v312_v11  ;;  %v331_v19 = vmul.f32 %v328_v13, %v313_v16 }
 0x422   :  { %v383_v17 = vmul.f32 %v774_v14, %v330_v15  ;;  %v384_v21 = vmul.f32 %v774_v14, %v331_v19  ;;  %v558_v14 = vlaneseq }
 0x424   :  { %v389_v20 = vadd.f32 %v775_v18, %v383_v17  ;;  %v390_v24 = vadd.f32 %v775_v18, %v384_v21  ;;  %v559_v17 = vshrl.u32 %v558_v14, 7  ;;  %v562_v18 = vand.u32 127, %v558_v14 }
 0x426   :  { %721 = vmatmul.msk.f32.vlgmr.msra.gmra.mxu2 %vm220_vm9, %v389_v20  ;;  %v560_v20 = vadd.s32 8, %v559_v17  ;;  %vm563_vm2 = vcmp.ne.s32.totalorder %v559_v17, %v562_v18 }
 0x428   :  { %vm564_vm3 = vcmp.ne.s32.totalorder %v560_v20, %v562_v18 }
 0x42e   :  { %722 = vmatmul.msk.f32.gmra.mxu2 %vm220_vm9, %v390_v24 }
 0x436   :  { %723 = vmatmul.msk.f32.gmra.mxu2 %vm220_vm9, %v391_v25 }
 0x43e   :  { %724 = vmatmul.msk.f32.gmra.mxu2 %vm220_vm9, %v392_v29 }
 0x4a9   :  { %v428_v33 = vpop.f32.mrf.mxu2 }
 0x4aa   :  { %v429_v34 = vadd.f32 %v776_v32, %v428_v33 }
 0x4ac   :  { %v440_v35 = vmax.f32 %v429_v34, 0.0  ;;  %495 = vrot.lane.b32.xlu0 %v429_v34, %s847_s1 }
 0x4ae   :  { %725 = vmatmul.msk.f32.vlgmr.msrb.gmra.mxu3 %vm220_vm9, %v440_v35 }
 0x4b1   :  { %v431_v7 = vpop.f32.mrf.mxu2 }
 0x4b2   :  { %v432_v36 = vadd.f32 %v776_v32, %v431_v7 }
 0x4b4   :  { %v441_v37 = vmax.f32 %v432_v36, 0.0  ;;  %596 = vrot.lane.b32.xlu0 %v874_v0, %s846_s0  ;;  %v514_v0 = vld [vmem:[#allocation4 + $0xc0] sm:$0xff] }
 0x4b5   :  { %541 = vmatpush.msrb.mxu0 %v514_v0 }
 0x4b6   :  { %726 = vmatmul.msk.f32.gmra.mxu3 %vm220_vm9, %v441_v37 }
 0x4b9   :  { %v434_v39 = vpop.f32.mrf.mxu2 }
 0x4ba   :  { %v435_v40 = vadd.f32 %v776_v32, %v434_v39 }
 0x4bc   :  { %v442_v41 = vmax.f32 %v435_v40, 0.0  ;;  %499 = vrot.lane.b32.xlu1 %v435_v40, %s847_s1  ;;  %643 = vrot.lane.b32.xlu0 %v886_v5, %s846_s0  ;;  %v513_v5 = vld [vmem:[#allocation4 + $0xb8] sm:$0xff] }
 0x4bd   :  { %542 = vmatpush.msrb.mxu0 %v513_v5 }
 0x4be   :  { %727 = vmatmul.msk.f32.gmra.mxu3 %vm220_vm9, %v442_v41 }
 0x4bf   :  { %543 = vmatpush.msrb.mxu0 %v512_v45 }
 0x4c1   :  { %v437_v42 = vpop.f32.mrf.mxu2  ;;  %544 = vmatpush.msrb.mxu0 %v511_v46 }
 0x4c2   :  { %v438_v43 = vadd.f32 %v776_v32, %v437_v42 }
 0x4c4   :  { %v443_v44 = vmax.f32 %v438_v43, 0.0  ;;  %501 = vrot.lane.b32.xlu2 %v438_v43, %s847_s1  ;;  %598 = vrot.lane.b32.xlu1 %v884_v4, %s846_s0 }
 0x4c6   :  { %728 = vmatmul.msk.f32.gmra.mxu3 %vm220_vm9, %v443_v44 }
 0x4cc   :  { %497 = vrot.lane.b32.xlu2 %v432_v36, %s847_s1 }
 0x4d4   :  { %641 = vrot.lane.b32.xlu2 %v876_v1, %s846_s0 }
 0x51e   :  { %v502_v48 = vpop.permute.xlu2 %501  ;;  %v496_v4 = vpop.permute.xlu0 %495 }
 0x526   :  { %v498_v53 = vpop.permute.xlu2 %497  ;;  %v597_v15 = vpop.permute.xlu0 %596 }
 0x52e   :  { %v500_v58 = vpop.permute.xlu1 %499  ;;  %v642_v62 = vpop.permute.xlu2 %641 }
 0x52f   :  { %v644_v34 = vpop.permute.xlu0 %643 }
 0x531   :  { %v479_v49 = vpop.f32.mrf.mxu3 }
 0x532   :  { %v480_v38 = vadd.f32 %v777_v47, %v479_v49 }
 0x534   :  { %v1002_v50 = vadd.f32 %v496_v4, %v480_v38 }
 0x536   :  { %729 = vmatmul.msk.f32.vlgmr.msrb.gmra.mxu0 %vm220_vm9, %v1002_v50  ;;  %v599_v21 = vpop.permute.xlu1 %598 }
 0x539   :  { %v482_v51 = vpop.f32.mrf.mxu3 }
 0x53a   :  { %v483_v1 = vadd.f32 %v777_v47, %v482_v51 }
 0x53c   :  { %v1006_v54 = vadd.f32 %v498_v53, %v483_v1 }
 0x53e   :  { %730 = vmatmul.msk.f32.gmra.mxu0 %vm220_vm9, %v1006_v54  ;;  %733 = vmatpush.xpose.msk.msrb.mxu1 %vm220_vm9, %v1006_v54 }
 0x541   :  { %v485_v55 = vpop.f32.mrf.mxu3 }
 0x542   :  { %v486_v56 = vadd.f32 %v777_v47, %v485_v55  ;;  %734 = vmatpush.xpose.msk.msrb.mxu1 %vm220_vm9, %v1002_v50 }
 0x544   :  { %v1014_v59 = vadd.f32 %v500_v58, %v486_v56 }
 0x545   :  { %735 = vmatmul.msk.f32.vlgmr.msrb.gmra.mxu1 %vm220_vm9, %v1002_v50 }
 0x546   :  { %731 = vmatmul.msk.f32.gmra.mxu0 %vm220_vm9, %v1014_v59 }
 0x549   :  { %v488_v60 = vpop.f32.mrf.mxu3 }
 0x54a   :  { %v489_v61 = vadd.f32 %v777_v47, %v488_v60 }
 0x54c   :  { %v1020_v63 = vadd.f32 %v502_v48, %v489_v61 }
 0x54d   :  { %736 = vmatmul.msk.f32.gmra.mxu1 %vm220_vm9, %v1006_v54 }
 0x54e   :  { %732 = vmatmul.msk.f32.gmra.mxu0 %vm220_vm9, %v1020_v63  ;;  %741 = vmatpush.xpose.msk.msrb.mxu2 %vm220_vm9, %v1020_v63 }
 0x552   :  { %742 = vmatpush.xpose.msk.msrb.mxu2 %vm220_vm9, %v1014_v59 }
 0x555   :  { %743 = vmatmul.msk.f32.vlgmr.msrb.gmra.mxu2 %vm220_vm9, %v1014_v59 }
 0x55d   :  { %744 = vmatmul.msk.f32.gmra.mxu2 %vm220_vm9, %v1020_v63 }
 0x5b3   :  { %v546_v3 = vpop.f32.mrf.mxu0 }
 0x5b4   :  { %v547_v6 = vadd.f32 %v778_v2, %v546_v3 }
 0x5b6   :  { %661 = vrot.lane.b32.xlu1 %v547_v6, %s848_s21 }
 0x5bb   :  { %v549_v8 = vpop.f32.mrf.mxu0 }
 0x5bc   :  { %v550_v9 = vadd.f32 %v778_v2, %v549_v8 }
 0x5be   :  { %663 = vrot.lane.b32.xlu2 %v550_v9, %s848_s21 }
 0x5c2   :  { %v582_v10 = vpop.f32.mrf.mxu1 }
 0x5c3   :  { %v737_v11 = vclamps-f32 %v582_v10, 13.815511  ;;  %v552_v12 = vpop.f32.mrf.mxu0 }
 0x5c4   :  { %v553_v13 = vadd.f32 %v778_v2, %v552_v12 }
 0x5c5   :  { %v602_v16 = vadd.f32 %v737_v11, %v597_v15 }
 0x5c6   :  { %665 = vrot.lane.b32.xlu0 %v553_v13, %s848_s21 }
 0x5c7   :  { %vm604_vm1 = vcmp.gt.f32.partialorder %v602_v16, 0.0 }
 0x5c8   :  { %v739_v27 = vsel %vm604_vm1, 1.0, %v849_v26 }
 0x5c9   :  { %v610_v25 = vsel %vm563_vm2, %v739_v27, 0.0 }
 0x5ca   :  { %v585_v19 = vpop.f32.mrf.mxu1 }
 0x5cb   :  { %v738_v22 = vclamps-f32 %v585_v19, 13.815511  ;;  %v555_v23 = vpop.f32.mrf.mxu0 }
 0x5cc   :  { %v556_v52 = vadd.f32 %v778_v2, %v555_v23 }
 0x5cd   :  { %v603_v24 = vadd.f32 %v738_v22, %v599_v21 }
 0x5ce   :  { %667 = vrot.lane.b32.xlu1 %v556_v52, %s848_s21 }
 0x5cf   :  { %vm605_vm4 = vcmp.gt.f32.partialorder %v603_v24, 0.0 }
 0x5d0   :  { %v740_v57 = vsel %vm605_vm4, 1.0, %v849_v26 }
 0x5d1   :  { %v611_v28 = vsel %vm564_vm3, %v740_v57, 0.0 }
 0x5d2   :  { %v760_v29 = vpack.i.bf16 %v611_v28, %v610_v25 }
 0x5d4   :  { %761 = vrot.lane.b32.xlu2 %v760_v29, %s850_s22 }
 0x5d8   :  { %v629_v30 = vpop.f32.mrf.mxu2 }
 0x5d9   :  { %v745_v31 = vclamps-f32 %v629_v30, 13.815511 }
 0x5db   :  { %v647_v32 = vadd.f32 %v745_v31, %v642_v62 }
 0x5dd   :  { %vm649_vm5 = vcmp.gt.f32.partialorder %v647_v32, 0.0 }
 0x5de   :  { %v747_v36 = vsel %vm649_vm5, 1.0, %v849_v26 }
 0x5df   :  { %v655_v39 = vsel %vm563_vm2, %v747_v36, 0.0 }
 0x5e0   :  { %v632_v33 = vpop.f32.mrf.mxu2 }
 0x5e1   :  { %v746_v35 = vclamps-f32 %v632_v33, 13.815511 }
 0x5e3   :  { %v648_v7 = vadd.f32 %v746_v35, %v644_v34 }
 0x5e5   :  { %vm650_vm6 = vcmp.gt.f32.partialorder %v648_v7, 0.0 }
 0x5e6   :  { %v748_v37 = vsel %vm650_vm6, 1.0, %v849_v26 }
 0x5e7   :  { %v656_v40 = vsel %vm564_vm3, %v748_v37, 0.0 }
 0x5e8   :  { %v765_v41 = vpack.i.bf16 %v656_v40, %v655_v39 }
 0x5ea   :  { %766 = vrot.lane.b32.xlu0 %v765_v41, %s850_s22 }
 0x618   :  { %v664_v42 = vpop.permute.xlu2 %663 }
 0x619   :  { %v690_v45 = vsel %vm220_vm9, %v1006_v54, %v664_v42 }
 0x628   :  { %v662_v43 = vpop.permute.xlu1 %661 }
 0x629   :  { %v689_v46 = vsel %vm220_vm9, %v1002_v50, %v662_v43 }
 0x62e   :  { %v762_v44 = vpop.permute.xlu2 %761 }
 0x62f   :  { %v764_v0 = vunpack.i.h.bf16 %v762_v44  ;;  %v763_v5 = vunpack.i.l.bf16 %v762_v44 }
 0x631   :  { %v695_v47 = vsel %vm693_vm7, %v690_v45, %v764_v0  ;;  %v694_v48 = vsel %vm693_vm7, %v689_v46, %v763_v5 }
 0x632   :  { %v700_v49 = vsel %vm698_vm8, %v695_v47, 0.0  ;;  %v699_v38 = vsel %vm698_vm8, %v694_v48, 0.0 }
 0x633   :  { %704 = vst [vmem:[%s1072_s2 + $0x8] sm:$0xff] %v700_v49 }
 0x634   :  { %703 = vst [vmem:[%s1072_s2] sm:$0xff] %v699_v38 }
 0x638   :  { %v666_v4 = vpop.permute.xlu0 %665 }
 0x639   :  { %v691_v54 = vsel %vm220_vm9, %v1014_v59, %v666_v4 }
 0x640   :  { %v668_v51 = vpop.permute.xlu1 %667 }
 0x641   :  { %v692_v55 = vsel %vm220_vm9, %v1020_v63, %v668_v51 }
 0x65c   :  { %v767_v1 = vpop.permute.xlu0 %766 }
 0x65d   :  { %v769_v50 = vunpack.i.h.bf16 %v767_v1  ;;  %v768_v53 = vunpack.i.l.bf16 %v767_v1 }
 0x65f   :  { %v697_v56 = vsel %vm693_vm7, %v692_v55, %v769_v50  ;;  %v696_v58 = vsel %vm693_vm7, %v691_v54, %v768_v53 }
 0x660   :  { %v702_v60 = vsel %vm698_vm8, %v697_v56, 0.0  ;;  %v701_v61 = vsel %vm698_vm8, %v696_v58, 0.0 }
 0x661   :  { %706 = vst [vmem:[%s1072_s2 + $0x18] sm:$0xff] %v702_v60 }
 0x662   :  { %705 = vst [vmem:[%s1072_s2 + $0x10] sm:$0xff] %v701_v61 }
 0x663   :  { %711 = vsyncpa [#allocation3], 1 }
 0x664   :  { %712 = vsyncpa [#allocation5], 1 }

</bundles_post_ra>
